<compile_context>
chip_gen: v5e
topology: v5e:2x2
jax: 0.10.0
libtpu: 0.0.40
codegen_flags: <defaults>
</compile_context>

<pallas_src>
import jax
import jax.numpy as jnp
from jax.experimental import pallas as pl
from jax.experimental.pallas import tpu as pltpu


def _h_sigmoid_kernel(x_ref, o_ref):
    x = x_ref[...]
    # relu6(x + 3) / 6  ==  clip(x + 3, 0, 6) * (1/6)   (<=1 ulp vs /6)
    y = jnp.clip(x + 3.0, 0.0, 6.0) * (1.0 / 6.0)
    o_ref[...] = y.astype(o_ref.dtype)


_ALIGNED_COLS = (2048, 1024, 512, 256, 128)


def _pick_cols(total: int) -> int:
    """Column count giving a zero-copy (rows, cols) view of the flat tensor.

    Prefers lane-aligned (multiple-of-128) widths -> fully unmasked vector
    stores; among those, prefers one that leaves >= 8 rows so sublanes are
    fully used. Otherwise returns the largest divisor in [8, 2048] (lane tail
    of each row is masked, but we still avoid any host-side pad/copy).
    Returns 0 only for pathological sizes (e.g. prime element counts).
    """
    aligned = [k for k in _ALIGNED_COLS if total % k == 0]
    for k in aligned:
        if total // k >= 8:
            return k
    if aligned:
        return aligned[0]
    best = 0
    d = 1
    while d * d <= total:
        if total % d == 0:
            for c in (d, total // d):
                if 8 <= c <= 2048 and c > best:
                    best = c
        d += 1
    return best


def h_sigmoid(
    x: jax.Array,
    *,
    target_block_bytes: int = 6 << 20,   # ~6 MiB input per grid step (v7x sweet spot)
    vmem_limit_bytes: int = 48 << 20,    # overrides v5e's 16 MiB scoped default
    donate_input: bool = False,          # set True only if the caller donates x
) -> jax.Array:
    """Elementwise hard-sigmoid, matching torch ReLU6(x+3)/6 on any-shape input."""
    orig_shape = x.shape
    dtype = x.dtype
    total = x.size
    if total == 0:
        return x
    itemsize = jnp.dtype(dtype).itemsize

    K = _pick_cols(total)
    padded = False
    if K == 0:
        # TODO(synk): pathological element counts (no divisor in [8, 2048], e.g.
        # prime totals) fall back to a padded copy; real conv activations never
        # hit this path.
        K = 128
        rows = pl.cdiv(total, K)
        xf = jnp.pad(x.reshape(-1), (0, rows * K - total))
        x2d = xf.reshape(rows, K)
        padded = True
    else:
        rows = total // K
        x2d = x.reshape(rows, K)  # contiguous reshape: zero-copy, no pad

    # Rows per block: ~target_block_bytes of input, rounded to a multiple of 32
    # (unmasked sublanes for f32/bf16/int8/fp8).
    row_bytes = K * itemsize
    tr = max(32, (target_block_bytes // row_bytes) // 32 * 32)
    if tr >= rows:
        if rows >= 64:
            # Keep at least 2 grid steps so the "parallel" axis can shard across
            # v7x's two TensorCores (no-op on single-TC v5e/v6e).
            tr = max(32, (pl.cdiv(rows, 2) // 32) * 32)
        else:
            tr = rows  # full-extent block is always legal, even if rows % 8 != 0
    grid = (pl.cdiv(rows, tr),)

    cost = pl.CostEstimate(
        flops=3 * total,                       # add + clip + mul per element (approx)
        transcendentals=0,
        bytes_accessed=2 * total * itemsize,   # read + write, no padding traffic
    )

    out2d = pl.pallas_call(
        _h_sigmoid_kernel,
        out_shape=jax.ShapeDtypeStruct(x2d.shape, dtype),
        grid_spec=pltpu.PrefetchScalarGridSpec(
            num_scalar_prefetch=0,
            grid=grid,
            in_specs=[pl.BlockSpec((tr, K), lambda i: (i, 0))],
            out_specs=pl.BlockSpec((tr, K), lambda i: (i, 0)),
        ),
        compiler_params=pltpu.CompilerParams(
            dimension_semantics=("parallel",),
            vmem_limit_bytes=vmem_limit_bytes,
        ),
        cost_estimate=cost,
        input_output_aliases=({0: 0} if donate_input else {}),
    )(x2d)

    out = out2d
    if padded:
        out = out.reshape(-1)[:total]
    return out.reshape(orig_shape)


def h_sigmoid_ref(x: jax.Array) -> jax.Array:
    return jnp.clip(x + 3.0, 0.0, 6.0) / 6.0


if __name__ == "__main__":
    k1, k2 = jax.random.split(jax.random.PRNGKey(0))
    h_sig = jax.jit(h_sigmoid)

    # Lane-aligned conv activation (total = 2048 -> zero-copy (8, 256) view).
    x = jax.random.normal(k1, (2, 4, 16, 16), dtype=jnp.float32) * 4.0
    out = jax.block_until_ready(h_sig(x))
    ref = h_sigmoid_ref(x)
    assert out.shape == x.shape and out.dtype == x.dtype
    assert jnp.allclose(out, ref, atol=1e-6, rtol=1e-6)

    # Non-lane-aligned spatial dims (H*W = 196, total = 3136 -> zero-copy
    # (4, 784) view; no pad, no post-kernel slice).
    x2 = jax.random.normal(k2, (2, 8, 14, 14), dtype=jnp.float32) * 4.0
    out2 = jax.block_until_ready(h_sig(x2))
    ref2 = h_sigmoid_ref(x2)
    assert out2.shape == x2.shape and out2.dtype == x2.dtype
    assert jnp.allclose(out2, ref2, atol=1e-6, rtol=1e-6)

    print("KERNEL_OK")
</pallas_src>

<mosaic_0001>
module attributes {stable_mosaic.version = 11 : i64} {
  func.func @_h_sigmoid_kernel(%arg0: i32, %arg1: memref<8x256xf32, #tpu.memory_space<vmem>>, %arg2: memref<8x256xf32, #tpu.memory_space<vmem>>) attributes {dimension_semantics = [#tpu.dimension_semantics<parallel>], iteration_bounds = array<i64: 1>, scalar_prefetch = 0 : i64, scratch_operands = 0 : i64, tpu.core_type = #tpu.core_type<tc>, window_params = [{transform_indices = @transform_0, window_bounds = array<i64: 8, 256>}, {transform_indices = @transform_1, window_bounds = array<i64: 8, 256>}]} {
    %c0 = arith.constant 0 : index
    %c0_0 = arith.constant 0 : index
    %0 = vector.load %arg1[%c0, %c0_0] : memref<8x256xf32, #tpu.memory_space<vmem>>, vector<8x256xf32>
    %cst = arith.constant 3.000000e+00 : f32
    %1 = vector.broadcast %cst : f32 to vector<8x256xf32>
    %2 = arith.addf %0, %1 : vector<8x256xf32>
    %cst_1 = arith.constant 0.000000e+00 : f32
    %cst_2 = arith.constant 6.000000e+00 : f32
    %3 = vector.broadcast %cst_1 : f32 to vector<8x256xf32>
    %4 = arith.maximumf %3, %2 : vector<8x256xf32>
    %5 = vector.broadcast %cst_2 : f32 to vector<8x256xf32>
    %6 = arith.minimumf %5, %4 : vector<8x256xf32>
    %cst_3 = arith.constant 0.166666672 : f32
    %7 = vector.broadcast %cst_3 : f32 to vector<8x256xf32>
    %8 = arith.mulf %6, %7 : vector<8x256xf32>
    %c0_4 = arith.constant 0 : index
    %c0_5 = arith.constant 0 : index
    %9 = vector.load %arg2[%c0_4, %c0_5] : memref<8x256xf32, #tpu.memory_space<vmem>>, vector<8x256xf32>
    tpu.vector_store %arg2[%c0_4, %c0_5], %8 {strides = array<i32>} : memref<8x256xf32, #tpu.memory_space<vmem>>, vector<8x256xf32>,
    return
  }
  func.func @transform_0(%arg0: i32) -> (i32, i32) {
    %c0_i32 = arith.constant 0 : i32
    %c0_i32_0 = arith.constant 0 : i32
    return %arg0, %c0_i32 : i32, i32
  }
  func.func @transform_1(%arg0: i32) -> (i32, i32) {
    %c0_i32 = arith.constant 0 : i32
    %c0_i32_0 = arith.constant 0 : i32
    return %arg0, %c0_i32 : i32, i32
  }
}

</mosaic_0001>

<bundles_post_ra>
// kernel: h_sigmoid.1
= control target key start
LH: loop header
LB: loop body
LE: loop exit
PB: predicated region body
PF: predicated region fallthrough
CT: control target
= control target key end

     0   :  { %s46_s0 = inlined_call_operand.vmem [shape: f32[8,256], index: 0, kind: input, shape index: {}]   ;;  %s47_s1 = inlined_call_operand.vmem [shape: f32[8,256], index: 1, kind: output, shape index: {}]  }
   0x1   :  { %v8_v0 = vld [vmem:[%s46_s0] sm:$0xff]  ;;  %v9_v1 = vld [vmem:[%s46_s0 + $0x8] sm:$0xff] }
   0x2   :  { %v10_v2 = vadd.f32 3.0, %v8_v0  ;;  %v11_v3 = vadd.f32 3.0, %v9_v1 }
   0x4   :  { %v12_v4 = vmax.f32 %v10_v2, 0.0  ;;  %v13_v5 = vmax.f32 %v11_v3, 0.0 }
   0x6   :  { %v14_v6 = vmin.f32 %v12_v4, 6.0  ;;  %v15_v7 = vmin.f32 %v13_v5, 6.0 }
   0x8   :  { %v16_v8 = vmul.f32 0.16666667, %v14_v6  ;;  %v17_v9 = vmul.f32 0.16666667, %v15_v7 }
   0xa   :  { %18 = vst [vmem:[%s47_s1] sm:$0xff] %v16_v8 }
   0xb   :  { %19 = vst [vmem:[%s47_s1 + $0x8] sm:$0xff] %v17_v9 }

</bundles_post_ra>
